<compile_context>
chip_gen: v7x
topology: tpu7x:2x2x1
jax: 0.10.0
libtpu: 0.0.40
codegen_flags: <defaults>
</compile_context>

<pallas_src>
import jax
import jax.numpy as jnp
from jax.experimental import pallas as pl
from jax.experimental.pallas import tpu as pltpu


_LANE = 128
_DEFAULT_TILE_ROWS = 2048      # (2048, 128) f32 block = 1 MiB
_SMALL_INPUT_ELEMS = 65536     # below this, XLA's fused sin is strictly faster


def _sinus_kernel(x_ref, o_ref):
    # Elementwise sine on the current VMEM tile (VPU/EUP path).
    o_ref[...] = jnp.sin(x_ref[...])


def _sublane_multiple(dtype) -> int:
    # f32 packs (8,128) per vreg tile, bf16 (16,128), int8/fp8 (32,128).
    itemsize = jnp.dtype(dtype).itemsize
    return 8 * max(1, 4 // max(1, itemsize))


def sinus(x, *, tile_rows=_DEFAULT_TILE_ROWS, small_input_elems=_SMALL_INPUT_ELEMS):
    """Apply sin elementwise via a Pallas TPU kernel. Works for any shape."""
    orig_shape = x.shape
    n = x.size

    if n == 0:
        return jnp.sin(x)

    # Small-input fast path: pallas_call launch + DMA setup dominates tiny
    # activations; no effect on large-tensor throughput.
    if n < small_input_elems:
        return jnp.sin(x)

    # Flatten to a lane-dense (rows, 128) slab. Pad only to a lane multiple
    # (at most 127 extra elements); the cdiv grid handles the ragged tail
    # row-block, so there is no block-granularity pad and no output slice
    # copy in the common (n % 128 == 0) case.
    x_flat = jnp.ravel(x)
    n_pad = pl.cdiv(n, _LANE) * _LANE
    if n_pad != n:
        x_flat = jnp.pad(x_flat, (0, n_pad - n))
    rows = n_pad // _LANE
    x2d = x_flat.reshape(rows, _LANE)

    # Keep tile rows a multiple of the dtype's sublane packing, and shrink the
    # tile when the input is small so the grid has >= 2 steps (v7x megacore).
    sub = _sublane_multiple(x.dtype)
    if rows < 2 * tile_rows:
        tile_rows = max(sub, ((pl.cdiv(rows, 2) + sub - 1) // sub) * sub)

    grid = (pl.cdiv(rows, tile_rows),)

    out2d = pl.pallas_call(
        _sinus_kernel,
        out_shape=jax.ShapeDtypeStruct((rows, _LANE), x.dtype),
        grid=grid,
        in_specs=[pl.BlockSpec((tile_rows, _LANE), lambda i: (i, 0))],
        out_specs=pl.BlockSpec((tile_rows, _LANE), lambda i: (i, 0)),
        compiler_params=pltpu.CompilerParams(
            dimension_semantics=("parallel",),
        ),
    )(x2d)

    if n_pad != n:
        return out2d.reshape(-1)[:n].reshape(orig_shape)
    return out2d.reshape(orig_shape)


if __name__ == "__main__":
    key = jax.random.PRNGKey(0)

    # Small NCHW-shaped input consistent with a typical activation use.
    x = jax.random.normal(key, (2, 4, 16, 16), dtype=jnp.float32)
    y = jax.block_until_ready(sinus(x))
    assert y.shape == x.shape and y.dtype == x.dtype
    assert jnp.allclose(y, jnp.sin(x), atol=1e-6, rtol=1e-6)

    # Force the Pallas kernel path on the small input (bypass fast path) to
    # exercise the adaptive-tile / 2-step-grid logic.
    y_k = jax.block_until_ready(sinus(x, small_input_elems=0))
    assert jnp.allclose(y_k, jnp.sin(x), atol=1e-6, rtol=1e-6)

    # Larger input that naturally takes the kernel path, plus a ragged size
    # (not a multiple of 128) to exercise lane padding + masked tail writes.
    k1, k2 = jax.random.split(key)
    x_big = jax.random.normal(k1, (4, 8, 64, 64), dtype=jnp.float32)
    y_big = jax.block_until_ready(sinus(x_big))
    assert jnp.allclose(y_big, jnp.sin(x_big), atol=1e-6, rtol=1e-6)

    x_ragged = jax.random.normal(k2, (3, 5, 67, 67), dtype=jnp.float32)
    y_ragged = jax.block_until_ready(sinus(x_ragged))
    assert y_ragged.shape == x_ragged.shape and y_ragged.dtype == x_ragged.dtype
    assert jnp.allclose(y_ragged, jnp.sin(x_ragged), atol=1e-6, rtol=1e-6)

    print("KERNEL_OK")
</pallas_src>

<mosaic_0001>
module attributes {stable_mosaic.version = 11 : i64} {
  func.func @_sinus_kernel(%arg0: i32, %arg1: memref<8x128xf32, #tpu.memory_space<vmem>>, %arg2: memref<8x128xf32, #tpu.memory_space<vmem>>) attributes {dimension_semantics = [#tpu.dimension_semantics<parallel>], iteration_bounds = array<i64: 2>, scalar_prefetch = 0 : i64, scratch_operands = 0 : i64, tpu.core_type = #tpu.core_type<tc>, window_params = [{transform_indices = @transform_0, window_bounds = array<i64: 8, 128>}, {transform_indices = @transform_1, window_bounds = array<i64: 8, 128>}]} {
    %c0 = arith.constant 0 : index
    %c0_0 = arith.constant 0 : index
    %0 = vector.load %arg1[%c0, %c0_0] : memref<8x128xf32, #tpu.memory_space<vmem>>, vector<8x128xf32>
    %1 = math.sin %0 : vector<8x128xf32>
    %c0_1 = arith.constant 0 : index
    %c0_2 = arith.constant 0 : index
    %2 = vector.load %arg2[%c0_1, %c0_2] : memref<8x128xf32, #tpu.memory_space<vmem>>, vector<8x128xf32>
    tpu.vector_store %arg2[%c0_1, %c0_2], %1 {strides = array<i32>} : memref<8x128xf32, #tpu.memory_space<vmem>>, vector<8x128xf32>,
    return
  }
  func.func @transform_0(%arg0: i32) -> (i32, i32) {
    %c0_i32 = arith.constant 0 : i32
    %c0_i32_0 = arith.constant 0 : i32
    return %arg0, %c0_i32 : i32, i32
  }
  func.func @transform_1(%arg0: i32) -> (i32, i32) {
    %c0_i32 = arith.constant 0 : i32
    %c0_i32_0 = arith.constant 0 : i32
    return %arg0, %c0_i32 : i32, i32
  }
}

</mosaic_0001>

<bundles_post_ra>
// kernel: tpu_custom_call.1
= control target key start
LH: loop header
LB: loop body
LE: loop exit
PB: predicated region body
PF: predicated region fallthrough
CT: control target
= control target key end

     0   :  { %6 = vsyncpa [#allocation3], 0  ;;  %s700_s0 = inlined_call_operand.hbm [shape: f32[16,128], index: 0, kind: input, shape index: {}]   ;;  %s701_s1 = inlined_call_operand.hbm [shape: f32[16,128], index: 1, kind: output, shape index: {}]  }
   0x1   :  { %8 = vsyncpa [#allocation3 + $0x1], 0 }
   0x2   :  { %9 = vsyncpa [#allocation4], 0 }
   0x3   :  { %11 = vsyncpa [#allocation4 + $0x1], 0  ;;  %s514_s6 = smov 0   ;;  %s516_s7 = smov 0  }
   0x4   :  { %s518_s8 = smov 0   ;;  %s520_s9 = smov 0  }
   0x5 LB: > { %s535_s10 = sadd.s32 4294967295, %s494_s9   ;;  %s322_s11 = sadd.s32 4294967294, %s494_s9   ;;  %s494_s9 = sphi %s520_s9, %s716_s9   ;;  %s490_s8 = sphi %s518_s8, %s715_s8   ;;  %s486_s7 = sphi %s516_s7, %s714_s7   ;;  %s482_s6 = sphi %s514_s6, %s713_s6  }
   0x6   : > { %s539_s12 = sadd.s32 1, %s494_s9   ;;  %s24_s13 = sadd.s32 1, %s490_s8 }
   0x7   : > { %s21_s14 = ssub.s32 %s494_s9, %s539_s12  ;;  %p31_p0 = scmp.ne.s32.totalorder %s490_s8, %s486_s7 }
   0x8   : > { %p22_p1 = scmp.eq.s32.totalorder %s21_s14, 0  ;;  %p32_p2 = scmp.eq.s32.totalorder %s494_s9, 0 }
   0x9   : > { %p37_p3 = scmp.ne.s32.totalorder %s486_s7, %s482_s6  ;;  %p38_p4 = scmp.eq.s32.totalorder %s535_s10, 0 }
   0xa   : > { %s551_s15 = scalar_select %p22_p1, %s490_s8, %s24_s13  }
   0xb   : > { %p553_p5 = por %p32_p2, %p31_p0  ;;  %p557_p6 = por %p38_p4, %p37_p3 }
   0xc   : > { %p61_p7 = scmp.eq.s32.totalorder %s535_s10, 1  ;;  %p67_p8 = scmp.eq.s32.totalorder %s322_s11, 1 }
   0xd   : > { %p354_p10 = scmp.lt.s32.totalorder %s494_s9, 2  ;;  %s87_s20 = sand.u32 1, %s490_s8  }
   0xe   : > { %p564_p11 = por %p61_p7, %p31_p0  ;;  %p568_p12 = por %p67_p8, %p37_p3 }
   0xf   : > { %s326_s21 = sshll.u32 %s494_s9, 7  ;;  %s325_s22 = sshll.u32 %s87_s20, 3 }
  0x10   : > { %s705_s18 = scalar_select %p564_p11, 1, 0 }
  0x11   : > { %s706_s19 = scalar_select %p568_p12, 1, 0 }
  0x12   : > { %s577_s25 = scalar_lea.hbm %s700_s0, %s326_s21  ;;  %s91_s26 = scalar_lea.vmem [#allocation2], %s325_s22 }
  0x13   : > { %s98_s27 = sshll.u32 %s91_s26, 4  ;;  %p581_p13 = pnand %p354_p10, %p553_p5  ;;  %s585_s27 = int_to_ptr.vmem [resolvable:$true] %s98_s27 }
  0x14   : > { %s88_s29 = scalar_lea.sflag [#allocation3], %s87_s20  ;;  %s398_s30 = scalar_lea.hbm %s577_s25, 128 }
  0x15   : > { %p399_p2 = scmp.ne.s32.totalorder %s577_s25, %s398_s30  ;;  %p400_p3 = pneg %p581_p13 }
  0x16   : > { %s403_s4 = scalar_lea.hbm %s700_s0, 256  ;;  %p404_p5 = scmp.lt.u32.totalorder %s577_s25, %s700_s0 }
  0x17   : > { %p401_p4 = pnand %p400_p3, %p399_p2  ;;  %p405_p8 = scmp.lt.u32.totalorder %s403_s4, %s398_s30 }
  0x18   : > { %p407_p9 = scmp.lt.u32.totalorder %s398_s30, %s577_s25 }
  0x19   : > { %p402_p7 = pneg %p401_p4  ;;  %p406_p10 = por %p405_p8, %p404_p5 }
  0x1b   : > { %p408_p0 = por %p407_p9, %p406_p10 }
  0x1d   : > { %p409_p1 = pnand %p408_p0, %p402_p7 }
  0x1f   : > { %412 = shalt.err (!%p409_p1)
}
  0x20   : > { %s413_s13 = scalar_lea.vmem %s585_s27, 128  ;;  %s496_s14 = smov [#allocation2]  }
  0x21   : > { %p414_p2 = scmp.ne.s32.totalorder %s585_s27, %s413_s13  ;;  %s418_s16 = sshll.u32 %s496_s14, 4  ;;  %s419_s16 = int_to_ptr.vmem [resolvable:$false] %s418_s16 }
  0x22   : > { %s420_s20 = scalar_lea.vmem %s419_s16, 256  ;;  %p421_p11 = scmp.lt.s32.totalorder %s585_s27, %s419_s16 }
  0x23   : > { %p416_p4 = pnand %p414_p2, %p400_p3  ;;  %p422_p5 = scmp.lt.s32.totalorder %s420_s20, %s413_s13 }
  0x25   : > { %p417_p12 = pneg %p416_p4  ;;  %p423_p8 = por %p422_p5, %p421_p11 }
  0x27   : > { %p424_p9 = pnand %p423_p8, %p417_p12 }
  0x29   : > { %427 = shalt.err (!%p424_p9)
}
  0x2a   : > { %349 = dma.hbm_to_vmem [thread:$0]  (!%p581_p13), %s577_s25, 128, %s585_s27, %s88_s29  }
  0x2b   : > { %p708_p0 = scmp.lt.s32.totalorder %s494_s9, 3  ;;  %p709_p1 = scmp.ge.s32.totalorder %s494_s9, 1 }
  0x2d   : > { %p104_p3 = pnand %p709_p1, %p708_p0 }
  0x2e   : > { %s619_s21 = sand.u32 (!%p104_p3), 1, %s486_s7  }
  0x2f   : > { %107 = sbr.rel (%p104_p3) target bundleno = 150 (0x96), region = 24  ;;  %s328_s22 = sshll.u32 (!%p104_p3), %s619_s21, 3 }
  0x30   : > { %s110_s23 = scalar_lea.sflag (!%p104_p3), [#allocation3], %s619_s21  ;;  %s113_s24 = scalar_lea.vmem (!%p104_p3), [#allocation2], %s328_s22 }
  0x36   : > { %473 = dma.done.wait (%p557_p6), %s110_s23, 128  }
  0x37   : > { %475 = vsyncadd (%p557_p6), %s110_s23, 4294967168  ;;  %v629_v0 = vld [vmem:[%s113_s24] sm:$0xff]  ;;  %v497_v12 = vmov 683565275   ;;  %v498_v14 = vmov 2475754826  }
  0x38   : > { %v136_v1 = vand.u32 2139095040, %v629_v0  ;;  %v133_v3 = vand.u32 2147483647, %v629_v0  ;;  %v499_v16 = vmov 2131351028   ;;  %vm135_vm7 = vcmp.lt.s32.totalorder %v629_v0, 0 }
  0x39   : > { %v500_v18 = vmov 2102212464   ;;  %v501_v20 = vmov 920167782   ;;  %v502_v27 = vmov 1326507024   ;;  %vm225_vm12 = vweird.f32 %v629_v0 }
  0x3a   : > { %v137_v2 = vshrl.u32 %v136_v1, 23  ;;  %v140_v6 = vand.u32 8388607, %v133_v3  ;;  %vm134_vm8 = vcmp.le.f32.partialorder %v133_v3, 0.7853982  ;;  %s131_s17 = scalar_lea.vmem [#allocation5], %s328_s22 }
  0x3b   : > { %s252_s25 = sshll.u32 %s131_s17, 4  ;;  %s335_s26 = sshll.u32 %s535_s10, 7  ;;  %s653_s25 = int_to_ptr.vmem [resolvable:$true] %s252_s25 }
  0x3c   : > { %v330_v4 = vadd.s32 4294967169, %v137_v2  ;;  %v141_v9 = vor.u32 8388608, %v140_v6  ;;  %s658_s29 = scalar_lea.hbm %s701_s1, %s335_s26  ;;  %s239_s30 = scalar_lea.sflag [#allocation4], %s619_s21 }
  0x3d   : > { %s428_s2 = scalar_lea.vmem %s653_s25, 128  ;;  %p710_p11 = scmp.ne.s32.totalorder %s705_s18, 0 }
  0x3e   : > { %v143_v5 = vadd.s32 1, %v330_v4  ;;  %v181_v29 = vshll.u32 %v141_v9, 8  ;;  %p429_p6 = scmp.ne.s32.totalorder %s653_s25, %s428_s2  ;;  %s503_s10 = smov [#allocation5]  }
  0x3f   : > { %s432_s3 = sshll.u32 %s503_s10, 4  ;;  %s433_s3 = int_to_ptr.vmem [resolvable:$false] %s432_s3 }
  0x40   : > { %vm144_vm0 = vcmp.gt.s32.totalorder %v143_v5, 0  ;;  %p430_p12 = pnand %p429_p6, %p710_p11  ;;  %s434_s4 = scalar_lea.vmem %s433_s3, 256 }
  0x41   : > { %v145_v7 = vsel %vm144_vm0, %v143_v5, 0  ;;  %p435_p7 = scmp.lt.s32.totalorder %s653_s25, %s433_s3  ;;  %p436_p10 = scmp.lt.s32.totalorder %s434_s4, %s428_s2 }
  0x42   : > { %v147_v8 = vand.u32 31, %v145_v7  ;;  %v146_v10 = vshrl.u32 %v145_v7, 5  ;;  %p431_p13 = pneg %p430_p12 }
  0x43   : > { %p437_p2 = por %p436_p10, %p435_p7 }
  0x44   : > { %v148_v11 = vsub.s32 32, %v147_v8  ;;  %v150_v13 = vshll.u32 %v497_v12, %v147_v8  ;;  %v153_v15 = vshll.u32 %v498_v14, %v147_v8  ;;  %v156_v17 = vshll.u32 %v499_v16, %v147_v8 }
  0x45   : > { %v159_v19 = vshll.u32 %v500_v18, %v147_v8  ;;  %v162_v21 = vshll.u32 %v501_v20, %v147_v8  ;;  %vm165_vm1 = vcmp.lt.s32.totalorder %v146_v10, 1  ;;  %vm168_vm2 = vcmp.lt.s32.totalorder %v146_v10, 4  ;;  %p438_p4 = pnand %p437_p2, %p431_p13 }
  0x46   : > { %v149_v22 = vshrl.u32 %v497_v12, %v148_v11  ;;  %v151_v23 = vshrl.u32 %v498_v14, %v148_v11  ;;  %v154_v24 = vshrl.u32 %v499_v16, %v148_v11  ;;  %v157_v25 = vshrl.u32 %v500_v18, %v148_v11 }
  0x47   : > { %v160_v26 = vshrl.u32 %v501_v20, %v148_v11  ;;  %v163_v28 = vshrl.u32 %v502_v27, %v148_v11  ;;  %vm166_vm3 = vcmp.lt.s32.totalorder %v146_v10, 2  ;;  %vm167_vm4 = vcmp.lt.s32.totalorder %v146_v10, 3 }
  0x48   : > { %v152_v30 = vor.u32 %v151_v23, %v150_v13  ;;  %v155_v31 = vor.u32 %v154_v24, %v153_v15  ;;  %v158_v32 = vor.u32 %v157_v25, %v156_v17 }
  0x49   : > { %v161_v33 = vor.u32 %v160_v26, %v159_v19  ;;  %v164_v34 = vor.u32 %v163_v28, %v162_v21 }
  0x4a   : > { %v169_v35 = vsel %vm165_vm1, %v149_v22, %v152_v30  ;;  %v170_v36 = vsel %vm168_vm2, %v158_v32, 2102212464  ;;  %v173_v37 = vsel %vm165_vm1, %v152_v30, %v155_v31  ;;  %v177_v38 = vsel %vm165_vm1, %v155_v31, %v158_v32 }
  0x4b   : > { %v171_v39 = vsel %vm167_vm4, %v155_v31, %v170_v36  ;;  %v174_v40 = vsel %vm168_vm2, %v161_v33, 920167782  ;;  %v178_v41 = vsel %vm168_vm2, %v164_v34, 1326507024 }
  0x4c   : > { %v175_v42 = vsel %vm167_vm4, %v158_v32, %v174_v40  ;;  %v179_v43 = vsel %vm167_vm4, %v161_v33, %v178_v41  ;;  %v172_v44 = vsel %vm166_vm3, %v169_v35, %v171_v39 }
  0x4d   : > { %v176_v45 = vsel %vm166_vm3, %v173_v37, %v175_v42  ;;  %v180_v46 = vsel %vm166_vm3, %v177_v38, %v179_v43  ;;  %v188_v51 = vmul.u32 %v181_v29, %v172_v44 }
  0x4e   : > { %v635_v47 = vmul.u32.u64.low %v181_v29, %v180_v46  ;;  %v636_v48 = vmul.u32.u64.high %v181_v29, %v180_v46, %v635_v47  ;;  %v638_v49 = vmul.u32.u64.low %v181_v29, %v176_v45  ;;  %v639_v50 = vmul.u32.u64.high %v181_v29, %v176_v45, %v638_v49 }
  0x50   : > { %vm190_vm5 = vc.u32 %v636_v48, %v638_v49  ;;  %v191_v52 = vadd.s32 1, %v639_v50  ;;  %v189_v63 = vadd.s32 %v638_v49, %v636_v48 }
  0x52   : > { %v192_v53 = vsel %vm190_vm5, %v191_v52, %v639_v50 }
  0x53   : > { %v193_v54 = vadd.s32 %v192_v53, %v188_v51 }
  0x55   : > { %v194_v55 = vadd.s32 536870912, %v193_v54 }
  0x57   : > { %v195_v56 = vshrl.u32 %v194_v55, 30 }
  0x59   : > { %v196_v57 = vshll.u32 %v195_v56, 30  ;;  %v219_v13 = vsub.s32 4, %v195_v56 }
  0x5b   : > { %v197_v58 = vsub.s32 %v193_v54, %v196_v57  ;;  %v220_v16 = vsel %vm135_vm7, %v219_v13, %v195_v56 }
  0x5c   : > { %v222_v19 = vsel %vm134_vm8, 0, %v220_v16 }
  0x5d   : > { %v199_v59 = vsub.s32 0, %v197_v58  ;;  %v226_v20 = vadd.s32 3, %v222_v19 }
  0x5f   : > { %v331_v60 = vmin.u32 %v199_v59, %v197_v58  ;;  %v227_v21 = vand.u32 3, %v226_v20 }
  0x61   : > { %v201_v61 = vclz %v331_v60  ;;  %vm232_vm9 = vcmp.eq.s32.totalorder %v227_v21, 2  ;;  %vm229_vm10 = vcmp.eq.s32.totalorder %v227_v21, 0  ;;  %vm228_vm11 = vcmp.lt.s32.totalorder %v227_v21, 2 }
  0x63   : > { %v332_v62 = vadd.s32 4294967294, %v201_v61 }
  0x65   : > { %vm333_vm6 = vcmp.lt.s32.totalorder %v332_v62, 0 }
  0x66   : > { %v204_v1 = vsel %vm333_vm6, 0, %v332_v62 }
  0x67   : > { %v205_v2 = vsub.s32 32, %v204_v1  ;;  %v206_v4 = vshll.u32 %v197_v58, %v204_v1  ;;  %v209_v5 = vsub.s32 4294967266, %v204_v1 }
  0x69   : > { %v207_v6 = vshrl.u32 %v189_v63, %v205_v2  ;;  %v210_v7 = vadd.s32 127, %v209_v5 }
  0x6b   : > { %v208_v8 = vor.u32 %v207_v6, %v206_v4  ;;  %v211_v9 = vshll.u32 %v210_v7, 23 }
  0x6d   : > { %v212_v10 = vor.u32 4788187, %v211_v9  ;;  %v215_v11 = vcvt.s32.f32 %v208_v8 }
  0x6f   : > { %v213_v12 = vand.u32 2147483647, %v212_v10 }
  0x71   : > { %v216_v14 = vmul.f32 %v215_v11, %v213_v12 }
  0x73   : > { %v217_v15 = vxor.u32 2147483648, %v216_v14 }
  0x75   : > { %v218_v17 = vsel %vm135_vm7, %v217_v15, %v216_v14 }
  0x76   : > { %v221_v18 = vsel %vm134_vm8, %v629_v0, %v218_v17 }
  0x77   : > { %394 = vcosq.f32 %v221_v18 }
  0x78   : > { %396 = vsinq.f32 %v221_v18 }
  0x81   : > { %v395_v22 = vpop.eup %394 }
  0x82   : > { %v397_v23 = vpop.eup %396  ;;  %v233_v24 = vxor.u32 2147483648, %v395_v22 }
  0x83   : > { %v230_v3 = vxor.u32 2147483648, %v397_v23 }
  0x84   : > { %v234_v25 = vsel %vm232_vm9, %v233_v24, %v397_v23 }
  0x85   : > { %v231_v26 = vsel %vm229_vm10, %v395_v22, %v230_v3 }
  0x86   : > { %v235_v27 = vsel %vm228_vm11, %v231_v26, %v234_v25 }
  0x87   : > { %v236_v28 = vsel %vm225_vm12, nan, %v235_v27 }
  0x88   : > { %237 = vst [vmem:[%s131_s17] sm:$0xff] %v236_v28 }
  0x89   : > { %441 = shalt.err (!%p438_p4)
}
  0x8a   : > { %s442_s5 = scalar_lea.hbm %s658_s29, 128  ;;  %s446_s14 = scalar_lea.hbm %s701_s1, 256 }
  0x8b   : > { %p443_p5 = scmp.ne.s32.totalorder %s658_s29, %s442_s5  ;;  %p447_p0 = scmp.lt.u32.totalorder %s658_s29, %s701_s1 }
  0x8c   : > { %p448_p1 = scmp.lt.u32.totalorder %s446_s14, %s442_s5  ;;  %p450_p6 = scmp.lt.u32.totalorder %s442_s5, %s658_s29 }
  0x8d   : > { %p444_p8 = pnand %p443_p5, %p710_p11 }
  0x8e   : > { %p449_p3 = por %p448_p1, %p447_p0 }
  0x8f   : > { %p445_p9 = pneg %p444_p8 }
  0x90   : > { %p451_p12 = por %p450_p6, %p449_p3 }
  0x92   : > { %p452_p13 = pnand %p451_p12, %p445_p9 }
  0x94   : > { %455 = shalt.err (!%p452_p13)
}
  0x95   : > { %344 = dma.vmem_to_hbm [thread:$0]  (%p710_p11), %s653_s25, 128, %s658_s29, %s239_s30  }
  0x96 PF: > { %s264_s21 = sand.u32 1, %s482_s6   ;;  %p711_p7 = scmp.ne.s32.totalorder %s706_s19, 0 }
  0x97   : > { %p712_p10 = scmp.ge.s32.totalorder %s494_s9, 2  ;;  %s265_s22 = scalar_lea.sflag [#allocation4], %s264_s21 }
  0x99   : > { %p351_p2 = pnand %p712_p10, %p711_p7 }
  0x9b   : > { %477 = dma.done.wait (!%p351_p2), %s265_s22, 128  }
  0x9c   : > { %479 = vsyncadd (!%p351_p2), %s265_s22, 4294967168  ;;  %p14_p4 = scmp.ge.s32.totalorder %s539_s12, 4   ;;  %s713_s6 = smov %s486_s7 }
  0x9d   : > { %s714_s7 = smov %s490_s8  ;;  %s715_s8 = smov %s551_s15 }
  0x9e   : > { %s716_s9 = smov %s539_s12  ;;  %16 = sbr.rel (!%p14_p4) target bundleno = 5 (0x5), region = 69 }
  0xa5   :  { %270 = vsyncpa [#allocation3], 1 }
  0xa6   :  { %272 = vsyncpa [#allocation3 + $0x1], 1 }
  0xa7   :  { %273 = vsyncpa [#allocation4], 1 }
  0xa8   :  { %275 = vsyncpa [#allocation4 + $0x1], 1 }

</bundles_post_ra>
